<compile_context>
chip_gen: v7x
topology: tpu7x:2x2x1
jax: 0.10.0
libtpu: 0.0.40
codegen_flags: <defaults>
</compile_context>

<pallas_src>
import functools

import jax
import jax.numpy as jnp
from jax.experimental import pallas as pl
from jax.experimental.pallas import tpu as pltpu


# ----------------------------------------------------------------------------
# Hardware-aware constants
# ----------------------------------------------------------------------------
def _vmem_capacity_bytes() -> int:
    try:
        return int(pltpu.get_tpu_info().vmem_capacity_bytes)
    except Exception:
        return 64 * 1024 * 1024          # conservative (v7x per-TC VMEM)


_VMEM_CAPACITY = _vmem_capacity_bytes()
# Raise the scoped-VMEM limit above the 16/32 MiB defaults but keep headroom.
VMEM_LIMIT = int(max(32 * 1024 * 1024, (_VMEM_CAPACITY * 3) // 4))
# Node-row tile: multiple of 256 feeds the 256-wide MXU (v6e/v7x), is a
# multiple of 128 for v5e, and amortizes the ~0.35us per-grid-step overhead.
TILE_NODES = 256


def _round_up(x, m):
    return ((x + m - 1) // m) * m


def _pad2(x, rows, cols):
    return jnp.pad(x, ((0, rows - x.shape[0]), (0, cols - x.shape[1])))


# ----------------------------------------------------------------------------
# Kernel: tiled node aggregation   out = maybe_relu(sum_k adj[i,k] @ x[k])
# grid = (node row tiles, adjacency column tiles); reduction axis last,
# f32 accumulator in VMEM scratch (pattern P1 + P3).
# ----------------------------------------------------------------------------
def _aggregate_kernel(adj_ref, x_ref, out_ref, acc_ref, *, apply_relu):
    @pl.when(pl.program_id(1) == 0)
    def _init():
        acc_ref[...] = jnp.zeros_like(acc_ref)

    acc_ref[...] += jnp.dot(adj_ref[...], x_ref[...],
                            preferred_element_type=jnp.float32)

    @pl.when(pl.program_id(1) == pl.num_programs(1) - 1)
    def _finalize():
        r = acc_ref[...]
        if apply_relu:
            r = jnp.maximum(r, 0.0)
        out_ref[...] = r.astype(out_ref.dtype)


def aggregate(adj, x, *, apply_relu, out_dtype, tm=TILE_NODES, tk=TILE_NODES):
    n = adj.shape[0]
    d = x.shape[1]
    return pl.pallas_call(
        functools.partial(_aggregate_kernel, apply_relu=apply_relu),
        out_shape=jax.ShapeDtypeStruct((n, d), out_dtype),
        grid=(n // tm, n // tk),
        in_specs=[pl.BlockSpec((tm, tk), lambda i, k: (i, k)),
                  pl.BlockSpec((tk, d), lambda i, k: (k, 0))],
        out_specs=pl.BlockSpec((tm, d), lambda i, k: (i, 0)),
        scratch_shapes=[pltpu.VMEM((tm, d), jnp.float32)],
        compiler_params=pltpu.CompilerParams(
            dimension_semantics=("parallel", "arbitrary"),
            vmem_limit_bytes=VMEM_LIMIT),
    )(adj, x)


# ----------------------------------------------------------------------------
# Kernel: tiled feature projection   out = maybe_relu(x @ w)
# ----------------------------------------------------------------------------
def _project_kernel(x_ref, w_ref, out_ref, *, apply_relu):
    r = jnp.dot(x_ref[...], w_ref[...], preferred_element_type=jnp.float32)
    if apply_relu:
        r = jnp.maximum(r, 0.0)
    out_ref[...] = r.astype(out_ref.dtype)


def project(x, w, *, apply_relu, out_dtype, tm=TILE_NODES):
    n, d_in = x.shape
    d_out = w.shape[1]
    return pl.pallas_call(
        functools.partial(_project_kernel, apply_relu=apply_relu),
        out_shape=jax.ShapeDtypeStruct((n, d_out), out_dtype),
        grid=(n // tm,),
        in_specs=[pl.BlockSpec((tm, d_in), lambda i: (i, 0)),
                  pl.BlockSpec((d_in, d_out), lambda i: (0, 0))],
        out_specs=pl.BlockSpec((tm, d_out), lambda i: (i, 0)),
        compiler_params=pltpu.CompilerParams(
            dimension_semantics=("parallel",),
            vmem_limit_bytes=VMEM_LIMIT),
    )(x, w)


# ----------------------------------------------------------------------------
# Kernel: k-hop query aggregation with adj held VMEM-resident across hops
# (pays the adj HBM cost once).  Falls back to tiled per-hop streaming when
# adj does not fit the per-generation VMEM budget.
# ----------------------------------------------------------------------------
def _khop_resident_kernel(adj_ref, emb_ref, out_ref, *, num_hops):
    adj = adj_ref[...]
    q = emb_ref[...]
    for _ in range(num_hops):
        q = jnp.dot(adj, q, preferred_element_type=jnp.float32).astype(adj.dtype)
    out_ref[...] = q.astype(out_ref.dtype)


def k_hop_aggregate(adj, emb, *, num_hops):
    n_pad, e_pad = emb.shape
    adj_bytes = adj.size * adj.dtype.itemsize
    resident_bytes = adj_bytes + 4 * n_pad * e_pad * 4   # adj + working buffers
    if resident_bytes <= _VMEM_CAPACITY // 2:
        vmem = pl.BlockSpec(memory_space=pltpu.MemorySpace.VMEM)
        return pl.pallas_call(
            functools.partial(_khop_resident_kernel, num_hops=num_hops),
            out_shape=jax.ShapeDtypeStruct((n_pad, e_pad), jnp.bfloat16),
            in_specs=[vmem, vmem],
            out_specs=vmem,
            compiler_params=pltpu.CompilerParams(vmem_limit_bytes=VMEM_LIMIT),
        )(adj, emb)
    # Large-N fallback: stream adj from HBM once per hop (tiled matmul).
    # TODO(synk): ping-pong q between two VMEM buffers inside a single kernel
    # to avoid the extra HBM round-trip of the intermediate q between hops.
    q = emb
    for _ in range(num_hops):
        q = aggregate(adj, q, apply_relu=False, out_dtype=jnp.bfloat16)
    return q


# ----------------------------------------------------------------------------
# Kernel: RAGraph head (finetune branch), tiled over node rows.
#   in-kernel retrieval gather (K-hot selection matmul against the single
#   VMEM-resident [M, E+C] memory-bank slab), 0.5/0.5 mixing, 2-layer decoder,
#   masked softmax over the real classes, 0.5/0.5 label mixing.  Output is
#   lane-dense [tm, 128]; the wrapper slices back to C.
# ----------------------------------------------------------------------------
def _head_kernel(q_ref, idx_ref, mem_cat_ref, w1_ref, b1_ref, w2_ref, b2_ref,
                 out_ref, *, k_retrieve, num_class, e_pad,
                 retrieve_weight, label_weight):
    tm = q_ref.shape[0]
    m_pad = mem_cat_ref.shape[0]

    # ---- retrieval "gather": build K-hot selection matrix, reduce on the MXU
    #      against the fused [M, E+C] bank (one matmul for embeddings+labels).
    idx = idx_ref[...]                                         # [tm, K] int32
    proto_ids = jax.lax.broadcasted_iota(jnp.int32, (tm, m_pad), 1)
    sel = jnp.zeros((tm, m_pad), jnp.float32)
    for k in range(k_retrieve):                                # K is tiny/static
        sel = sel + (proto_ids == idx[:, k:k + 1]).astype(jnp.float32)
    sel = sel.astype(mem_cat_ref.dtype)

    rag = jnp.dot(sel, mem_cat_ref[...], preferred_element_type=jnp.float32)
    rag_embedding = rag[:, :e_pad]                             # SUM over K
    rag_label = rag[:, e_pad:] * (1.0 / k_retrieve)            # MEAN over K

    # ---- hidden = (1 - w) * query + w * retrieved-embedding-sum
    query = q_ref[...].astype(jnp.float32)
    hidden = query * (1.0 - retrieve_weight) + rag_embedding * retrieve_weight

    # ---- 2-layer decoder MLP (bf16 MXU matmuls, f32 accumulate)
    h1 = jnp.dot(hidden.astype(w1_ref.dtype), w1_ref[...],
                 preferred_element_type=jnp.float32) + b1_ref[...]
    h1 = jnp.maximum(h1, 0.0)
    logits = jnp.dot(h1.astype(w2_ref.dtype), w2_ref[...],
                     preferred_element_type=jnp.float32) + b2_ref[...]

    # ---- softmax over the real classes only (class dim is lane-padded to 128)
    lane = jax.lax.broadcasted_iota(jnp.int32, logits.shape, 1)
    logits = jnp.where(lane < num_class, logits, -1e30)
    m = jnp.max(logits, axis=1, keepdims=True)
    ex = jnp.exp(logits - m)
    decode = ex * pl.reciprocal(jnp.sum(ex, axis=1, keepdims=True), approx=True)

    out_ref[...] = decode * (1.0 - label_weight) + rag_label * label_weight


def ragraph_head(query_emb, idx, mem_cat, w1, b1, w2, b2, *,
                 num_class, k_retrieve, e_pad, retrieve_weight=0.5,
                 label_weight=0.5, tm=TILE_NODES):
    n_pad = query_emb.shape[0]
    m_pad, ec_pad = mem_cat.shape
    c_pad = ec_pad - e_pad
    kernel = functools.partial(
        _head_kernel, k_retrieve=k_retrieve, num_class=num_class, e_pad=e_pad,
        retrieve_weight=retrieve_weight, label_weight=label_weight)
    return pl.pallas_call(
        kernel,
        out_shape=jax.ShapeDtypeStruct((n_pad, c_pad), jnp.float32),
        grid=(n_pad // tm,),
        in_specs=[
            pl.BlockSpec((tm, e_pad), lambda i: (i, 0)),         # query emb
            pl.BlockSpec((tm, idx.shape[1]), lambda i: (i, 0)),  # top-K idx
            pl.BlockSpec((m_pad, ec_pad), lambda i: (0, 0)),     # mem bank slab
            pl.BlockSpec((e_pad, e_pad), lambda i: (0, 0)),      # W1
            pl.BlockSpec((1, e_pad), lambda i: (0, 0)),          # b1
            pl.BlockSpec((e_pad, c_pad), lambda i: (0, 0)),      # W2
            pl.BlockSpec((1, c_pad), lambda i: (0, 0)),          # b2
        ],
        out_specs=pl.BlockSpec((tm, c_pad), lambda i: (i, 0)),
        compiler_params=pltpu.CompilerParams(
            dimension_semantics=("parallel",),
            vmem_limit_bytes=VMEM_LIMIT),
    )(query_emb, idx, mem_cat, w1, b1, w2, b2)


# ----------------------------------------------------------------------------
# Full RAGraph forward
# ----------------------------------------------------------------------------
def ragraph_forward(features, adj, params, *, k_retrieve=4, query_graph_hop=3,
                    retrieve_weight=0.5, label_weight=0.5):
    n, f = features.shape
    e = params["w_pre"].shape[1]
    num_class = params["mem_lab"].shape[1]
    m = params["mem_emb"].shape[0]

    # ---- glue: adjacency normalization.
    # TODO(synk): exact Propagation/ToyGraphBase normalization is not given in
    # the source; using row-normalized (A + I).
    adj_sl = adj + jnp.eye(n, dtype=adj.dtype)
    adj_norm = adj_sl / jnp.sum(adj_sl, axis=1, keepdims=True)

    # ---- pad to TPU-friendly shapes (lane-dense, tileable), cast to bf16.
    n_pad = _round_up(n, TILE_NODES)
    f_pad = _round_up(f, 128)
    e_pad = _round_up(e, 128)
    c_pad = _round_up(num_class, 128)
    m_pad = _round_up(m, 128)

    adj_p = _pad2(adj_norm, n_pad, n_pad).astype(jnp.bfloat16)
    feat_p = _pad2(features, n_pad, f_pad).astype(jnp.bfloat16)
    w_pre_p = _pad2(params["w_pre"], f_pad, e_pad).astype(jnp.bfloat16)
    mem_emb_p = _pad2(params["mem_emb"], m_pad, e_pad).astype(jnp.bfloat16)
    mem_lab_p = _pad2(params["mem_lab"], m_pad, c_pad).astype(jnp.bfloat16)
    mem_cat_p = jnp.concatenate([mem_emb_p, mem_lab_p], axis=1)  # [M, E+C]
    w1_p = _pad2(params["w1"], e_pad, e_pad).astype(jnp.bfloat16)
    b1_p = _pad2(params["b1"], 1, e_pad).astype(jnp.float32)
    w2_p = _pad2(params["w2"], e_pad, c_pad).astype(jnp.bfloat16)
    b2_p = _pad2(params["b2"], 1, c_pad).astype(jnp.float32)

    # ---- pretrain GNN inference: relu(A @ X @ W), association chosen by
    #      min(F, E) to minimize FLOPs / intermediate size.
    if e_pad <= f_pad:
        xw = project(feat_p, w_pre_p, apply_relu=False, out_dtype=jnp.bfloat16)
        pretrain_emb = aggregate(adj_p, xw, apply_relu=True,
                                 out_dtype=jnp.bfloat16)
    else:
        ax = aggregate(adj_p, feat_p, apply_relu=False, out_dtype=jnp.bfloat16)
        pretrain_emb = project(ax, w_pre_p, apply_relu=True,
                               out_dtype=jnp.bfloat16)

    # ---- glue: top-K prototype retrieval indices.
    # TODO(synk): jax.lax.top_k has no clean Pallas equivalent; indices are
    # computed in XLA, the gather itself happens inside the head kernel.
    sim = (pretrain_emb[:n, :e].astype(jnp.float32)
           @ params["mem_emb"].astype(jnp.float32).T)
    _, idx = jax.lax.top_k(sim, k_retrieve)                    # [n, K] int32
    idx_p = jnp.pad(idx, ((0, n_pad - n), (0, 0))).astype(jnp.int32)

    # ---- 3-hop query aggregation (adj VMEM-resident when it fits).
    query_emb = k_hop_aggregate(adj_p, pretrain_emb, num_hops=query_graph_hop)

    # ---- head: in-kernel retrieval + decoder + softmax + label mixing.
    out_pad = ragraph_head(query_emb, idx_p, mem_cat_p,
                           w1_p, b1_p, w2_p, b2_p,
                           num_class=num_class, k_retrieve=k_retrieve,
                           e_pad=e_pad, retrieve_weight=retrieve_weight,
                           label_weight=label_weight)
    return out_pad[:n, :num_class], idx


# ----------------------------------------------------------------------------
# Pure-JAX f32 reference (same math) for correctness checking.
# ----------------------------------------------------------------------------
def ragraph_reference(features, adj, params, idx, *, query_graph_hop=3,
                      retrieve_weight=0.5, label_weight=0.5):
    n = features.shape[0]
    adj_sl = adj + jnp.eye(n, dtype=adj.dtype)
    adj_norm = adj_sl / jnp.sum(adj_sl, axis=1, keepdims=True)
    emb = jax.nn.relu(adj_norm @ features @ params["w_pre"])
    rag_emb = jnp.sum(params["mem_emb"][idx], axis=1)          # sum over K
    rag_lab = jnp.mean(params["mem_lab"][idx], axis=1)         # mean over K
    q = emb
    for _ in range(query_graph_hop):
        q = adj_norm @ q
    hidden = q * (1.0 - retrieve_weight) + rag_emb * retrieve_weight
    h1 = jax.nn.relu(hidden @ params["w1"] + params["b1"])
    logits = h1 @ params["w2"] + params["b2"]
    decode = jax.nn.softmax(logits, axis=1)
    return decode * (1.0 - label_weight) + rag_lab * label_weight


def make_params(key, feature_size, emb_size, num_class, mem_size):
    ks = jax.random.split(key, 5)
    w_pre = jax.random.normal(ks[0], (feature_size, emb_size), jnp.float32) * 0.1
    mem_emb = jax.random.normal(ks[1], (mem_size, emb_size), jnp.float32)
    mem_lab = jax.nn.softmax(
        jax.random.normal(ks[2], (mem_size, num_class), jnp.float32), axis=1)
    w1 = jax.random.normal(ks[3], (emb_size, emb_size), jnp.float32) * 0.1
    b1 = jnp.zeros((1, emb_size), jnp.float32)
    w2 = jax.random.normal(ks[4], (emb_size, num_class), jnp.float32) * 0.1
    b2 = jnp.zeros((1, num_class), jnp.float32)
    return dict(w_pre=w_pre, mem_emb=mem_emb, mem_lab=mem_lab,
                w1=w1, b1=b1, w2=w2, b2=b2)


if __name__ == "__main__":
    N, F, E, C, M, K = 300, 200, 32, 4, 96, 4

    key = jax.random.PRNGKey(0)
    k_feat, k_adj, k_par = jax.random.split(key, 3)

    features = jax.random.normal(k_feat, (N, F), jnp.float32)
    a = jax.random.uniform(k_adj, (N, N))
    adj = ((a + a.T) * 0.5 > 0.6).astype(jnp.float32)   # symmetric 0/1 adjacency

    params = make_params(k_par, F, E, C, M)

    out, idx = ragraph_forward(features, adj, params,
                               k_retrieve=K, query_graph_hop=3)
    out = jax.block_until_ready(out)

    assert out.shape == (N, C)
    assert bool(jnp.all(jnp.isfinite(out)))
    row_err = float(jnp.max(jnp.abs(jnp.sum(out, axis=1) - 1.0)))
    assert row_err < 0.05, f"row sums deviate from 1 by {row_err}"

    ref = ragraph_reference(features, adj, params, idx)
    max_err = float(jnp.max(jnp.abs(out - ref)))
    assert max_err < 0.05, f"max abs error vs f32 reference: {max_err}"

    print("KERNEL_OK")
</pallas_src>

<mosaic_0001>
module attributes {stable_mosaic.version = 11 : i64} {
  func.func @_project_kernel(%arg0: i32, %arg1: memref<256x256xbf16, #tpu.memory_space<vmem>>, %arg2: memref<256x128xbf16, #tpu.memory_space<vmem>>, %arg3: memref<256x128xbf16, #tpu.memory_space<vmem>>) attributes {dimension_semantics = [#tpu.dimension_semantics<parallel>], iteration_bounds = array<i64: 2>, scalar_prefetch = 0 : i64, scratch_operands = 0 : i64, tpu.core_type = #tpu.core_type<tc>, window_params = [{transform_indices = @transform_0, window_bounds = array<i64: 256, 256>}, {pipeline_mode = #tpu.pipeline_mode<synchronous>, transform_indices = @transform_1, window_bounds = array<i64: 256, 128>}, {transform_indices = @transform_2, window_bounds = array<i64: 256, 128>}]} {
    %c0 = arith.constant 0 : index
    %c0_0 = arith.constant 0 : index
    %0 = vector.load %arg1[%c0, %c0_0] : memref<256x256xbf16, #tpu.memory_space<vmem>>, vector<256x256xbf16>
    %c0_1 = arith.constant 0 : index
    %c0_2 = arith.constant 0 : index
    %1 = vector.load %arg2[%c0_1, %c0_2] : memref<256x128xbf16, #tpu.memory_space<vmem>>, vector<256x128xbf16>
    %cst = arith.constant dense<0.000000e+00> : vector<256x128xf32>
    %2 = tpu.matmul %0, %1, %cst {dimension_numbers = #tpu.dot_dimension_numbers<[1], [0], [0], [1], [0, 0, 1, 1], [], []>} : vector<256x256xbf16>, vector<256x128xbf16>, vector<256x128xf32> -> vector<256x128xf32>
    %3 = arith.truncf %2 : vector<256x128xf32> to vector<256x128xbf16>
    %c0_3 = arith.constant 0 : index
    %c0_4 = arith.constant 0 : index
    %4 = vector.load %arg3[%c0_3, %c0_4] : memref<256x128xbf16, #tpu.memory_space<vmem>>, vector<256x128xbf16>
    tpu.vector_store %arg3[%c0_3, %c0_4], %3 {strides = array<i32>} : memref<256x128xbf16, #tpu.memory_space<vmem>>, vector<256x128xbf16>,
    return
  }
  func.func @transform_0(%arg0: i32) -> (i32, i32) {
    %c0_i32 = arith.constant 0 : i32
    %c0_i32_0 = arith.constant 0 : i32
    return %arg0, %c0_i32 : i32, i32
  }
  func.func @transform_1(%arg0: i32) -> (i32, i32) {
    %c0_i32 = arith.constant 0 : i32
    %c0_i32_0 = arith.constant 0 : i32
    %c0_i32_1 = arith.constant 0 : i32
    return %c0_i32, %c0_i32_0 : i32, i32
  }
  func.func @transform_2(%arg0: i32) -> (i32, i32) {
    %c0_i32 = arith.constant 0 : i32
    %c0_i32_0 = arith.constant 0 : i32
    return %arg0, %c0_i32 : i32, i32
  }
}

</mosaic_0001>

<bundles_post_ra>
// kernel: tpu_custom_call.1
= control target key start
LH: loop header
LB: loop body
LE: loop exit
PB: predicated region body
PF: predicated region fallthrough
CT: control target
= control target key end

     0   :  { %7 = vsyncpa [#allocation3], 0  ;;  %s1810_s0 = inlined_call_operand.hbm [shape: bf16[512,256], index: 0, kind: input, shape index: {}]   ;;  %s1811_s1 = inlined_call_operand.hbm [shape: bf16[256,128], index: 1, kind: input, shape index: {}]   ;;  %s1812_s2 = inlined_call_operand.hbm [shape: bf16[512,128], index: 2, kind: output, shape index: {}]  }
   0x1   :  { %9 = vsyncpa [#allocation3 + $0x1], 0 }
   0x2   :  { %10 = vsyncpa [#allocation6], 0 }
   0x3   :  { %11 = vsyncpa [#allocation4], 0 }
   0x4   :  { %13 = vsyncpa [#allocation4 + $0x1], 0  ;;  %s1555_s9 = smov 0   ;;  %s1557_s10 = smov 0  }
   0x5   :  { %s1559_s11 = smov 0   ;;  %s1561_s12 = smov 0  }
   0x6 LB: > { %s1576_s13 = sadd.s32 4294967295, %s1529_s12   ;;  %s919_s14 = sadd.s32 4294967294, %s1529_s12   ;;  %s1529_s12 = sphi %s1561_s12, %s1832_s12   ;;  %s1525_s11 = sphi %s1559_s11, %s1831_s11   ;;  %s1521_s10 = sphi %s1557_s10, %s1830_s10   ;;  %s1517_s9 = sphi %s1555_s9, %s1829_s9  }
   0x7   : > { %p39_p0 = scmp.ne.s32.totalorder %s1521_s10, %s1517_s9  ;;  %p1813_p1 = scmp.eq.s32.totalorder %s1576_s13, 0 }
   0x8   : > { %p90_p3 = scmp.eq.s32.totalorder %s919_s14, 1  ;;  %p920_p5 = scmp.ge.s32.totalorder %s1529_s12, 1 }
   0x9   : > { %p1585_p4 = por %p1813_p1, %p39_p0  ;;  %p97_p7 = scmp.lt.s32.totalorder %s1529_s12, 3 }
   0xa   : > { %p1590_p6 = por %p90_p3, %p39_p0  ;;  %s1531_s18 = smov [#allocation5]  }
   0xb   : > { %s1816_s15 = scalar_select %p1585_p4, 1, 0 }
   0xc   : > { %s1817_s16 = scalar_select %p1590_p6, 1, 0 }
   0xd   : > { %p1595_p8 = pnand %p920_p5, %p97_p7  ;;  %s109_s19 = sshll.u32 %s1531_s18, 4  ;;  %s1599_s19 = int_to_ptr.vmem [resolvable:$true] %s109_s19 }
   0xe   : > { %s1611_s21 = sadd.s32 1, %s1529_s12   ;;  %s26_s22 = sadd.s32 1, %s1525_s11 }
   0xf   : > { %s1818_s17 = scalar_select %p1595_p8, 1, 0 }
  0x10   : > { %p1282_p9 = pneg %p1595_p8  ;;  %s23_s23 = ssub.s32 %s1529_s12, %s1611_s21 }
  0x11   : > { %s1401_s26 = scalar_lea.hbm %s1811_s1, 2048 }
  0x12   : > { %p1606_p11 = pnand %p1282_p9, %p1813_p1  ;;  %p1402_p12 = scmp.ne.s32.totalorder %s1811_s1, %s1401_s26 }
  0x13   : > { %p1408_p5 = scmp.lt.u32.totalorder %s1401_s26, %s1811_s1 }
  0x14   : > { %p1403_p13 = pneg %p1606_p11 }
  0x16   : > { %p1404_p0 = pnand %p1403_p13, %p1402_p12 }
  0x18   : > { %p1405_p3 = pneg %p1404_p0 }
  0x1a   : > { %p1410_p7 = pnand %p1408_p5, %p1405_p3 }
  0x1c   : > { %1413 = shalt.err (!%p1410_p7)
}
  0x1d   : > { %s1414_s3 = scalar_lea.vmem %s1599_s19, 2048  ;;  %p1422_p2 = scmp.lt.s32.totalorder %s1599_s19, %s1599_s19 }
  0x1e   : > { %p1415_p9 = scmp.ne.s32.totalorder %s1599_s19, %s1414_s3  ;;  %p1423_p6 = scmp.lt.s32.totalorder %s1414_s3, %s1414_s3 }
  0x20   : > { %p1417_p10 = pnand %p1415_p9, %p1403_p13  ;;  %p1424_p4 = por %p1423_p6, %p1422_p2 }
  0x22   : > { %p1418_p1 = pneg %p1417_p10 }
  0x24   : > { %p1425_p8 = pnand %p1424_p4, %p1418_p1 }
  0x26   : > { %1428 = shalt.err (!%p1425_p8)
}
  0x27   : > { %s1532_s4 = smov 64   ;;  %s1533_s5 = smov 4  }
  0x28   : > { %1285 = dma.hbm_to_vmem [thread:$0]  (!%p1606_p11), %s1811_s1, 2048, %s1599_s19, [#allocation6], %s1532_s4, %s1532_s4, %s1533_s5  }
  0x29   : > { %p24_p2 = scmp.eq.s32.totalorder %s23_s23, 0  ;;  %p33_p1 = scmp.ne.s32.totalorder %s1525_s11, %s1521_s10 }
  0x2a   : > { %p34_p4 = scmp.eq.s32.totalorder %s1529_s12, 0  ;;  %p1295_p6 = scmp.lt.s32.totalorder %s1529_s12, 2 }
  0x2b   : > { %s1642_s8 = scalar_select %p24_p2, %s1525_s11, %s26_s22  }
  0x2c   : > { %p35_p8 = por %p34_p4, %p33_p1  ;;  %p1820_p10 = scmp.eq.s32.totalorder %s1576_s13, 1 }
  0x2d   : > { %s123_s18 = sand.u32 1, %s1525_s11   ;;  %s1017_s24 = sshll.u32 %s1529_s12, 12 }
  0x2e   : > { %p1646_p12 = por %p1820_p10, %p33_p1  ;;  %s923_s25 = sshll.u32 %s123_s18, 8 }
  0x2f   : > { %s1655_s27 = scalar_lea.hbm %s1810_s0, %s1017_s24  ;;  %s127_s19 = scalar_lea.vmem [#allocation2], %s923_s25 }
  0x30   : > { %s135_s22 = sshll.u32 %s127_s19, 4  ;;  %p1657_p11 = pnand %p1295_p6, %p35_p8  ;;  %s1661_s22 = int_to_ptr.vmem [resolvable:$true] %s135_s22 }
  0x31   : > { %s1663_s28 = scalar_lea.sflag [#allocation3], %s123_s18  ;;  %s1429_s29 = scalar_lea.hbm %s1655_s27, 4096 }
  0x32   : > { %p1430_p13 = scmp.ne.s32.totalorder %s1655_s27, %s1429_s29  ;;  %p1431_p0 = pneg %p1657_p11 }
  0x33   : > { %s1434_s4 = scalar_lea.hbm %s1810_s0, 8192  ;;  %p1435_p7 = scmp.lt.u32.totalorder %s1655_s27, %s1810_s0 }
  0x34   : > { %p1432_p3 = pnand %p1431_p0, %p1430_p13  ;;  %p1436_p9 = scmp.lt.u32.totalorder %s1434_s4, %s1429_s29 }
  0x35   : > { %p1438_p1 = scmp.lt.u32.totalorder %s1429_s29, %s1655_s27 }
  0x36   : > { %p1433_p5 = pneg %p1432_p3  ;;  %p1437_p2 = por %p1436_p9, %p1435_p7 }
  0x38   : > { %p1439_p4 = por %p1438_p1, %p1437_p2 }
  0x3a   : > { %p1440_p6 = pnand %p1439_p4, %p1433_p5 }
  0x3c   : > { %1443 = shalt.err (!%p1440_p6)
}
  0x3d   : > { %s1444_s7 = scalar_lea.vmem %s1661_s22, 4096  ;;  %s1534_s18 = smov [#allocation2]  }
  0x3e   : > { %p1445_p8 = scmp.ne.s32.totalorder %s1661_s22, %s1444_s7  ;;  %s1449_s24 = sshll.u32 %s1534_s18, 4  ;;  %s1450_s24 = int_to_ptr.vmem [resolvable:$false] %s1449_s24 }
  0x3f   : > { %s1451_s25 = scalar_lea.vmem %s1450_s24, 8192  ;;  %p1452_p3 = scmp.lt.s32.totalorder %s1661_s22, %s1450_s24 }
  0x40   : > { %p1447_p10 = pnand %p1445_p8, %p1431_p0  ;;  %p1453_p7 = scmp.lt.s32.totalorder %s1451_s25, %s1444_s7 }
  0x42   : > { %p1448_p13 = pneg %p1447_p10  ;;  %p1454_p9 = por %p1453_p7, %p1452_p3 }
  0x44   : > { %p1455_p2 = pnand %p1454_p9, %p1448_p13 }
  0x46   : > { %1458 = shalt.err (!%p1455_p2)
}
  0x47   : > { %s1535_s20 = smov 128   ;;  %s1536_s26 = smov 8  }
  0x48   : > { %1289 = dma.hbm_to_vmem [thread:$0]  (!%p1657_p11), %s1655_s27, 4096, %s1661_s22, %s1663_s28, %s1535_s20, %s1535_s20, %s1536_s26  }
  0x49   : > { %p1823_p0 = scmp.ne.s32.totalorder %s1818_s17, 0 }
  0x4a   : > { %s1694_s19 = sand.u32 (!%p1823_p0), 1, %s1521_s10   ;;  %p1824_p5 = scmp.ne.s32.totalorder (!%p1823_p0), %s1816_s15, 0 }
  0x4b   : > { %147 = sbr.rel (%p1823_p0) target bundleno = 409 (0x199), region = 28  ;;  %s928_s29 = sshll.u32 (!%p1823_p0), %s1694_s19, 8 }
  0x4c   : > { %s150_s30 = scalar_lea.sflag (!%p1823_p0), [#allocation3], %s1694_s19  ;;  %s1698_s3 = scalar_lea.vmem (!%p1823_p0), [#allocation2], %s928_s29 }
  0x52   : > { %1504 = dma.done.wait (%p1824_p5), %s150_s30, 4096  }
  0x53   : > { %1506 = vsyncadd (%p1824_p5), %s150_s30, 4294963200  ;;  %p1825_p11 = scmp.eq.s32.totalorder %s1576_s13, 0 }
  0x55   : > { %1508 = dma.done.wait (%p1825_p11), [#allocation6], 2048   ;;  %p1826_p1 = pmov %p1825_p11 }
  0x56   : > { %v1337_v0 = vld [vmem:[#allocation5 + $0x40] sm:$0xff]   ;;  %v1339_v2 = vld [vmem:[#allocation5 + $0x48] sm:$0xff]   ;;  %v1341_v4 = vld [vmem:[#allocation5 + $0x50] sm:$0xff]   ;;  %s930_s15 = sshll.u32 %s1694_s19, 7  ;;  %s1050_s27 = sshll.u32 %s1576_s13, 11 }
  0x57   : > { %1510 = vsyncadd (%p1826_p1), [#allocation6], 4294965248  ;;  %v1338_v1 = vld [vmem:[#allocation5] sm:$0xff]   ;;  %1146 = vmatprep.subr.bf16.mxu0 %v1337_v0  ;;  %1258 = vmatprep.subr.bf16.mxu1 %v1337_v0  ;;  %v1340_v3 = vld [vmem:[#allocation5 + $0x8] sm:$0xff]   ;;  %s1741_s17 = scalar_lea.vmem [#allocation7], %s930_s15  ;;  %s1762_s4 = scalar_lea.hbm %s1812_s2, %s1050_s27 }
  0x58   : > { %1147 = vmatpush3.bf16.msra.mxu0 %v1338_v1  ;;  %1266 = vmatpush3.bf16.msra.mxu1 %v1338_v1  ;;  %v1342_v5 = vld [vmem:[#allocation5 + $0x10] sm:$0xff]   ;;  %v1343_v6 = vld [vmem:[#allocation5 + $0x58] sm:$0xff]   ;;  %v1345_v8 = vld [vmem:[#allocation5 + $0x60] sm:$0xff]   ;;  %s836_s22 = sshll.u32 %s1741_s17, 4  ;;  %s823_s13 = scalar_lea.sflag [#allocation4], %s1694_s19  ;;  %s1764_s22 = int_to_ptr.vmem [resolvable:$true] %s836_s22 }
  0x59   : > { %1148 = vmatprep.subr.bf16.mxu0 %v1339_v2  ;;  %1259 = vmatprep.subr.bf16.mxu1 %v1339_v2  ;;  %v1344_v7 = vld [vmem:[#allocation5 + $0x18] sm:$0xff]   ;;  %v1346_v9 = vld [vmem:[#allocation5 + $0x20] sm:$0xff]   ;;  %v1347_v10 = vld [vmem:[#allocation5 + $0x68] sm:$0xff]   ;;  %s1459_s5 = scalar_lea.vmem %s1764_s22, 2048  ;;  %s1537_s6 = smov [#allocation7]  }
  0x5a   : > { %v1355_v11 = vld [vmem:[%s1698_s3 + $0x4] ss:$8 sps:$4 sm:$0xff]   ;;  %v1349_v14 = vld [vmem:[#allocation5 + $0x70] sm:$0xff]   ;;  %v1351_v16 = vld [vmem:[#allocation5 + $0x78] sm:$0xff]   ;;  %p1460_p4 = scmp.ne.s32.totalorder %s1764_s22, %s1459_s5  ;;  %s1463_s7 = sshll.u32 %s1537_s6, 4  ;;  %s1464_s7 = int_to_ptr.vmem [resolvable:$false] %s1463_s7 }
  0x5b   : > { %v1358_v12 = vld [vmem:[%s1698_s3 + $0x84] ss:$8 sps:$4 sm:$0xff]   ;;  %533 = vmatprep.mubr.bf16.mxu0 %v1355_v11  ;;  %v1350_v15 = vld [vmem:[#allocation5 + $0x30] sm:$0xff]   ;;  %v1352_v17 = vld [vmem:[#allocation5 + $0x38] sm:$0xff]   ;;  %s1465_s18 = scalar_lea.vmem %s1464_s7, 4096  ;;  %p1466_p10 = scmp.lt.s32.totalorder %s1764_s22, %s1464_s7 }
  0x5c   : > { %1149 = vmatpush3.bf16.msra.mxu0 %v1340_v3  ;;  %1267 = vmatpush3.bf16.msra.mxu1 %v1340_v3  ;;  %v1348_v13 = vld [vmem:[#allocation5 + $0x28] sm:$0xff]   ;;  %v1359_v20 = vld [vmem:[%s1698_s3 + $0x14] ss:$8 sps:$4 sm:$0xff]   ;;  %v1363_v22 = vld [vmem:[%s1698_s3 + $0x10] ss:$8 sps:$4 sm:$0xff]   ;;  %p1461_p6 = pnand %p1460_p4, %p1646_p12  ;;  %p1467_p13 = scmp.lt.s32.totalorder %s1465_s18, %s1459_s5 }
  0x5d   : > { %1150 = vmatprep.subr.bf16.mxu0 %v1341_v4  ;;  %1260 = vmatprep.subr.bf16.mxu1 %v1341_v4  ;;  %v1353_v18 = vld [vmem:[%s1698_s3] ss:$8 sps:$4 sm:$0xff]   ;;  %v1361_v21 = vld [vmem:[%s1698_s3 + $0x94] ss:$8 sps:$4 sm:$0xff]   ;;  %v1364_v23 = vld [vmem:[%s1698_s3 + $0x90] ss:$8 sps:$4 sm:$0xff]  }
  0x5e   : > { %597 = vmatprep.mubr.bf16.mxu1 %v1358_v12  ;;  %v1356_v19 = vld [vmem:[%s1698_s3 + $0x80] ss:$8 sps:$4 sm:$0xff]   ;;  %v1365_v24 = vld [vmem:[%s1698_s3 + $0x24] ss:$8 sps:$4 sm:$0xff]   ;;  %v1371_v28 = vld [vmem:[%s1698_s3 + $0x34] ss:$8 sps:$4 sm:$0xff]   ;;  %p1462_p8 = pneg %p1461_p6  ;;  %p1468_p3 = por %p1467_p13, %p1466_p10 }
  0x5f   : > { %v1367_v25 = vld [vmem:[%s1698_s3 + $0xa4] ss:$8 sps:$4 sm:$0xff]   ;;  %v1369_v26 = vld [vmem:[%s1698_s3 + $0x20] ss:$8 sps:$4 sm:$0xff]   ;;  %v1373_v29 = vld [vmem:[%s1698_s3 + $0xb4] ss:$8 sps:$4 sm:$0xff]  }
  0x60   : > { %1151 = vmatpush3.bf16.msra.mxu0 %v1342_v5  ;;  %1268 = vmatpush3.bf16.msra.mxu1 %v1342_v5  ;;  %v1370_v27 = vld [vmem:[%s1698_s3 + $0xa0] ss:$8 sps:$4 sm:$0xff]   ;;  %v1375_v30 = vld [vmem:[%s1698_s3 + $0x30] ss:$8 sps:$4 sm:$0xff]   ;;  %v1377_v32 = vld [vmem:[%s1698_s3 + $0x44] ss:$8 sps:$4 sm:$0xff]   ;;  %p1469_p7 = pnand %p1468_p3, %p1462_p8 }
  0x61   : > { %1152 = vmatprep.subr.bf16.mxu0 %v1343_v6  ;;  %1261 = vmatprep.subr.bf16.mxu1 %v1343_v6  ;;  %v1376_v31 = vld [vmem:[%s1698_s3 + $0xb0] ss:$8 sps:$4 sm:$0xff]   ;;  %v1379_v33 = vld [vmem:[%s1698_s3 + $0xc4] ss:$8 sps:$4 sm:$0xff]   ;;  %v1381_v34 = vld [vmem:[%s1698_s3 + $0x40] ss:$8 sps:$4 sm:$0xff]  }
  0x62   : > { %v1382_v35 = vld [vmem:[%s1698_s3 + $0xc0] ss:$8 sps:$4 sm:$0xff]   ;;  %v1383_v36 = vld [vmem:[%s1698_s3 + $0x54] ss:$8 sps:$4 sm:$0xff]   ;;  %v1387_v38 = vld [vmem:[%s1698_s3 + $0x50] ss:$8 sps:$4 sm:$0xff]  }
  0x63   : > { %v1385_v37 = vld [vmem:[%s1698_s3 + $0xd4] ss:$8 sps:$4 sm:$0xff]   ;;  %v1388_v39 = vld [vmem:[%s1698_s3 + $0xd0] ss:$8 sps:$4 sm:$0xff]   ;;  %v1389_v40 = vld [vmem:[%s1698_s3 + $0x64] ss:$8 sps:$4 sm:$0xff]  }
  0x64   : > { %1153 = vmatpush3.bf16.msra.mxu0 %v1344_v7  ;;  %1269 = vmatpush3.bf16.msra.mxu1 %v1344_v7  ;;  %v1391_v41 = vld [vmem:[%s1698_s3 + $0xe4] ss:$8 sps:$4 sm:$0xff]   ;;  %v1393_v42 = vld [vmem:[%s1698_s3 + $0x60] ss:$8 sps:$4 sm:$0xff]   ;;  %v1395_v44 = vld [vmem:[%s1698_s3 + $0x74] ss:$8 sps:$4 sm:$0xff]  }
  0x65   : > { %1154 = vmatprep.subr.bf16.mxu0 %v1345_v8  ;;  %1262 = vmatprep.subr.bf16.mxu1 %v1345_v8  ;;  %v1394_v43 = vld [vmem:[%s1698_s3 + $0xe0] ss:$8 sps:$4 sm:$0xff]   ;;  %v1397_v45 = vld [vmem:[%s1698_s3 + $0xf4] ss:$8 sps:$4 sm:$0xff]   ;;  %v1399_v46 = vld [vmem:[%s1698_s3 + $0x70] ss:$8 sps:$4 sm:$0xff]  }
  0x66   : > { %v1400_v47 = vld [vmem:[%s1698_s3 + $0xf0] ss:$8 sps:$4 sm:$0xff]  }
  0x68   : > { %1155 = vmatpush3.bf16.msra.mxu0 %v1346_v9  ;;  %1270 = vmatpush3.bf16.msra.mxu1 %v1346_v9 }
  0x69   : > { %1156 = vmatprep.subr.bf16.mxu0 %v1347_v10  ;;  %1263 = vmatprep.subr.bf16.mxu1 %v1347_v10 }
  0x6c   : > { %1157 = vmatpush3.bf16.msra.mxu0 %v1348_v13  ;;  %1271 = vmatpush3.bf16.msra.mxu1 %v1348_v13 }
  0x6d   : > { %1158 = vmatprep.subr.bf16.mxu0 %v1349_v14  ;;  %1264 = vmatprep.subr.bf16.mxu1 %v1349_v14 }
  0x70   : > { %1159 = vmatpush3.bf16.msra.mxu0 %v1350_v15  ;;  %1272 = vmatpush3.bf16.msra.mxu1 %v1350_v15 }
  0x71   : > { %1160 = vmatprep.subr.bf16.mxu0 %v1351_v16  ;;  %1265 = vmatprep.subr.bf16.mxu1 %v1351_v16 }
  0x74   : > { %1161 = vmatpush3.bf16.msra.mxu0 %v1352_v17  ;;  %1273 = vmatpush3.bf16.msra.mxu1 %v1352_v17 }
  0x77   : > { %534 = vmatmul.mubr.bf16.vlgmr.msra.gmra.mrb[0].mxu0 %v1353_v18  ;;  %598 = vmatmul.mubr.bf16.vlgmr.msra.gmra.mrb[0].mxu1 %v1356_v19 }
  0x78   : > { %541 = vmatprep.mubr.bf16.mxu0 %v1359_v20  ;;  %605 = vmatprep.mubr.bf16.mxu1 %v1361_v21 }
  0x7f   : > { %542 = vmatmul.mubr.bf16.gmra.mrb[4].mxu0 %v1363_v22  ;;  %606 = vmatmul.mubr.bf16.gmra.mrb[4].mxu1 %v1364_v23 }
  0x80   : > { %549 = vmatprep.mubr.bf16.mxu0 %v1365_v24  ;;  %613 = vmatprep.mubr.bf16.mxu1 %v1367_v25 }
  0x87   : > { %550 = vmatmul.mubr.bf16.gmra.mrb[8].mxu0 %v1369_v26  ;;  %614 = vmatmul.mubr.bf16.gmra.mrb[8].mxu1 %v1370_v27 }
  0x88   : > { %557 = vmatprep.mubr.bf16.mxu0 %v1371_v28  ;;  %621 = vmatprep.mubr.bf16.mxu1 %v1373_v29 }
  0x8f   : > { %558 = vmatmul.mubr.bf16.gmra.mrb[12].mxu0 %v1375_v30  ;;  %622 = vmatmul.mubr.bf16.gmra.mrb[12].mxu1 %v1376_v31 }
  0x90   : > { %565 = vmatprep.mubr.bf16.mxu0 %v1377_v32  ;;  %629 = vmatprep.mubr.bf16.mxu1 %v1379_v33 }
  0x97   : > { %566 = vmatmul.mubr.bf16.gmra.mrb[16].mxu0 %v1381_v34  ;;  %630 = vmatmul.mubr.bf16.gmra.mrb[16].mxu1 %v1382_v35 }
  0x98   : > { %573 = vmatprep.mubr.bf16.mxu0 %v1383_v36  ;;  %637 = vmatprep.mubr.bf16.mxu1 %v1385_v37 }
  0x9f   : > { %574 = vmatmul.mubr.bf16.gmra.mrb[20].mxu0 %v1387_v38  ;;  %638 = vmatmul.mubr.bf16.gmra.mrb[20].mxu1 %v1388_v39 }
  0xa0   : > { %581 = vmatprep.mubr.bf16.mxu0 %v1389_v40  ;;  %645 = vmatprep.mubr.bf16.mxu1 %v1391_v41 }
  0xa7   : > { %582 = vmatmul.mubr.bf16.gmra.mrb[24].mxu0 %v1393_v42  ;;  %646 = vmatmul.mubr.bf16.gmra.mrb[24].mxu1 %v1394_v43 }
  0xa8   : > { %589 = vmatprep.mubr.bf16.mxu0 %v1395_v44  ;;  %653 = vmatprep.mubr.bf16.mxu1 %v1397_v45 }
  0xaf   : > { %590 = vmatmul.mubr.bf16.gmra.mrb[28].mxu0 %v1399_v46  ;;  %654 = vmatmul.mubr.bf16.gmra.mrb[28].mxu1 %v1400_v47 }
 0x14a   : > { %v1162_v48 = vpop.f32.mrb[0].mxu0  ;;  %v1210_v49 = vpop.f32.mrb[0].mxu1 }
 0x14b   : > { %v1163_v50 = vpop.f32.mrb[1].mxu0  ;;  %v1211_v51 = vpop.f32.mrb[1].mxu1 }
 0x14c   : > { %v1164_v52 = vadd.f32 %v1163_v50, %v1162_v48  ;;  %v1212_v53 = vadd.f32 %v1211_v51, %v1210_v49  ;;  %v1165_v54 = vpop.f32.mrb[2].mxu0  ;;  %v1213_v55 = vpop.f32.mrb[2].mxu1 }
 0x14d   : > { %v1166_v56 = vpop.f32.mrb[3].mxu0  ;;  %v1214_v57 = vpop.f32.mrb[3].mxu1 }
 0x14e   : > { %v1167_v58 = vadd.f32 %v1166_v56, %v1165_v54  ;;  %v1215_v59 = vadd.f32 %v1214_v57, %v1213_v55 }
 0x150   : > { %v1054_v60 = vpack.c.bf16 %v1167_v58, %v1164_v52  ;;  %v1094_v61 = vpack.c.bf16 %v1215_v59, %v1212_v53 }
 0x152   : > { %1055 = vst [vmem:[%s1741_s17] sm:$0xff] %v1054_v60   ;;  %1138 = vst [vmem:[%s1741_s17 + $0x40] sm:$0xff] %v1094_v61   ;;  %v1168_v62 = vpop.f32.mrb[4].mxu0  ;;  %v1216_v63 = vpop.f32.mrb[4].mxu1 }
 0x153   : > { %v1169_v0 = vpop.f32.mrb[5].mxu0  ;;  %v1217_v1 = vpop.f32.mrb[5].mxu1 }
 0x154   : > { %v1170_v2 = vadd.f32 %v1169_v0, %v1168_v62  ;;  %v1218_v3 = vadd.f32 %v1217_v1, %v1216_v63  ;;  %v1171_v4 = vpop.f32.mrb[6].mxu0  ;;  %v1219_v5 = vpop.f32.mrb[6].mxu1 }
 0x155   : > { %v1172_v6 = vpop.f32.mrb[7].mxu0  ;;  %v1220_v7 = vpop.f32.mrb[7].mxu1 }
 0x156   : > { %v1173_v8 = vadd.f32 %v1172_v6, %v1171_v4  ;;  %v1221_v9 = vadd.f32 %v1220_v7, %v1219_v5 }
 0x158   : > { %v1059_v10 = vpack.c.bf16 %v1173_v8, %v1170_v2  ;;  %v1099_v11 = vpack.c.bf16 %v1221_v9, %v1218_v3 }
 0x15a   : > { %1131 = vst [vmem:[%s1741_s17 + $0x8] sm:$0xff] %v1059_v10   ;;  %1139 = vst [vmem:[%s1741_s17 + $0x48] sm:$0xff] %v1099_v11   ;;  %v1174_v12 = vpop.f32.mrb[8].mxu0  ;;  %v1222_v13 = vpop.f32.mrb[8].mxu1 }
 0x15b   : > { %v1175_v14 = vpop.f32.mrb[9].mxu0  ;;  %v1223_v15 = vpop.f32.mrb[9].mxu1 }
 0x15c   : > { %v1176_v16 = vadd.f32 %v1175_v14, %v1174_v12  ;;  %v1224_v17 = vadd.f32 %v1223_v15, %v1222_v13  ;;  %v1177_v18 = vpop.f32.mrb[10].mxu0  ;;  %v1225_v19 = vpop.f32.mrb[10].mxu1 }
 0x15d   : > { %v1178_v20 = vpop.f32.mrb[11].mxu0  ;;  %v1226_v21 = vpop.f32.mrb[11].mxu1 }
 0x15e   : > { %v1179_v22 = vadd.f32 %v1178_v20, %v1177_v18  ;;  %v1227_v23 = vadd.f32 %v1226_v21, %v1225_v19 }
 0x160   : > { %v1064_v24 = vpack.c.bf16 %v1179_v22, %v1176_v16  ;;  %v1104_v25 = vpack.c.bf16 %v1227_v23, %v1224_v17 }
 0x162   : > { %1132 = vst [vmem:[%s1741_s17 + $0x10] sm:$0xff] %v1064_v24   ;;  %1140 = vst [vmem:[%s1741_s17 + $0x50] sm:$0xff] %v1104_v25   ;;  %v1180_v26 = vpop.f32.mrb[12].mxu0  ;;  %v1228_v27 = vpop.f32.mrb[12].mxu1 }
 0x163   : > { %v1181_v28 = vpop.f32.mrb[13].mxu0  ;;  %v1229_v29 = vpop.f32.mrb[13].mxu1 }
 0x164   : > { %v1182_v30 = vadd.f32 %v1181_v28, %v1180_v26  ;;  %v1230_v31 = vadd.f32 %v1229_v29, %v1228_v27  ;;  %v1183_v32 = vpop.f32.mrb[14].mxu0  ;;  %v1231_v33 = vpop.f32.mrb[14].mxu1 }
 0x165   : > { %v1184_v34 = vpop.f32.mrb[15].mxu0  ;;  %v1232_v35 = vpop.f32.mrb[15].mxu1 }
 0x166   : > { %v1185_v36 = vadd.f32 %v1184_v34, %v1183_v32  ;;  %v1233_v37 = vadd.f32 %v1232_v35, %v1231_v33 }
 0x168   : > { %v1069_v38 = vpack.c.bf16 %v1185_v36, %v1182_v30  ;;  %v1109_v39 = vpack.c.bf16 %v1233_v37, %v1230_v31 }
 0x16a   : > { %1133 = vst [vmem:[%s1741_s17 + $0x18] sm:$0xff] %v1069_v38   ;;  %1141 = vst [vmem:[%s1741_s17 + $0x58] sm:$0xff] %v1109_v39   ;;  %v1186_v40 = vpop.f32.mrb[16].mxu0  ;;  %v1234_v41 = vpop.f32.mrb[16].mxu1 }
 0x16b   : > { %v1187_v42 = vpop.f32.mrb[17].mxu0  ;;  %v1235_v43 = vpop.f32.mrb[17].mxu1 }
 0x16c   : > { %v1188_v44 = vadd.f32 %v1187_v42, %v1186_v40  ;;  %v1236_v45 = vadd.f32 %v1235_v43, %v1234_v41  ;;  %v1189_v46 = vpop.f32.mrb[18].mxu0  ;;  %v1237_v47 = vpop.f32.mrb[18].mxu1 }
 0x16d   : > { %v1190_v48 = vpop.f32.mrb[19].mxu0  ;;  %v1238_v49 = vpop.f32.mrb[19].mxu1 }
 0x16e   : > { %v1191_v50 = vadd.f32 %v1190_v48, %v1189_v46  ;;  %v1239_v51 = vadd.f32 %v1238_v49, %v1237_v47 }
 0x170   : > { %v1074_v52 = vpack.c.bf16 %v1191_v50, %v1188_v44  ;;  %v1114_v53 = vpack.c.bf16 %v1239_v51, %v1236_v45 }
 0x172   : > { %1134 = vst [vmem:[%s1741_s17 + $0x20] sm:$0xff] %v1074_v52   ;;  %1142 = vst [vmem:[%s1741_s17 + $0x60] sm:$0xff] %v1114_v53   ;;  %v1192_v54 = vpop.f32.mrb[20].mxu0  ;;  %v1240_v55 = vpop.f32.mrb[20].mxu1 }
 0x173   : > { %v1193_v56 = vpop.f32.mrb[21].mxu0  ;;  %v1241_v57 = vpop.f32.mrb[21].mxu1 }
 0x174   : > { %v1194_v58 = vadd.f32 %v1193_v56, %v1192_v54  ;;  %v1242_v59 = vadd.f32 %v1241_v57, %v1240_v55  ;;  %v1195_v60 = vpop.f32.mrb[22].mxu0  ;;  %v1243_v61 = vpop.f32.mrb[22].mxu1 }
 0x175   : > { %v1196_v62 = vpop.f32.mrb[23].mxu0  ;;  %v1244_v63 = vpop.f32.mrb[23].mxu1 }
 0x176   : > { %v1197_v0 = vadd.f32 %v1196_v62, %v1195_v60  ;;  %v1245_v1 = vadd.f32 %v1244_v63, %v1243_v61 }
 0x178   : > { %v1079_v2 = vpack.c.bf16 %v1197_v0, %v1194_v58  ;;  %v1119_v3 = vpack.c.bf16 %v1245_v1, %v1242_v59 }
 0x17a   : > { %1135 = vst [vmem:[%s1741_s17 + $0x28] sm:$0xff] %v1079_v2   ;;  %1143 = vst [vmem:[%s1741_s17 + $0x68] sm:$0xff] %v1119_v3   ;;  %v1198_v4 = vpop.f32.mrb[24].mxu0  ;;  %v1246_v5 = vpop.f32.mrb[24].mxu1 }
 0x17b   : > { %v1199_v6 = vpop.f32.mrb[25].mxu0  ;;  %v1247_v7 = vpop.f32.mrb[25].mxu1 }
 0x17c   : > { %v1200_v8 = vadd.f32 %v1199_v6, %v1198_v4  ;;  %v1248_v9 = vadd.f32 %v1247_v7, %v1246_v5  ;;  %v1201_v10 = vpop.f32.mrb[26].mxu0  ;;  %v1249_v11 = vpop.f32.mrb[26].mxu1 }
 0x17d   : > { %v1202_v12 = vpop.f32.mrb[27].mxu0  ;;  %v1250_v13 = vpop.f32.mrb[27].mxu1 }
 0x17e   : > { %v1203_v14 = vadd.f32 %v1202_v12, %v1201_v10  ;;  %v1251_v15 = vadd.f32 %v1250_v13, %v1249_v11 }
 0x180   : > { %v1084_v16 = vpack.c.bf16 %v1203_v14, %v1200_v8  ;;  %v1124_v17 = vpack.c.bf16 %v1251_v15, %v1248_v9 }
 0x182   : > { %1136 = vst [vmem:[%s1741_s17 + $0x30] sm:$0xff] %v1084_v16   ;;  %1144 = vst [vmem:[%s1741_s17 + $0x70] sm:$0xff] %v1124_v17   ;;  %v1204_v18 = vpop.f32.mrb[28].mxu0  ;;  %v1252_v19 = vpop.f32.mrb[28].mxu1 }
 0x183   : > { %v1205_v20 = vpop.f32.mrb[29].mxu0  ;;  %v1253_v21 = vpop.f32.mrb[29].mxu1 }
 0x184   : > { %v1206_v22 = vadd.f32 %v1205_v20, %v1204_v18  ;;  %v1254_v23 = vadd.f32 %v1253_v21, %v1252_v19  ;;  %v1207_v24 = vpop.f32.mrb[30].mxu0  ;;  %v1255_v25 = vpop.f32.mrb[30].mxu1 }
 0x185   : > { %v1208_v26 = vpop.f32.mrb[31].mxu0  ;;  %v1256_v27 = vpop.f32.mrb[31].mxu1 }
 0x186   : > { %v1209_v28 = vadd.f32 %v1208_v26, %v1207_v24  ;;  %v1257_v29 = vadd.f32 %v1256_v27, %v1255_v25 }
 0x188   : > { %v1089_v30 = vpack.c.bf16 %v1209_v28, %v1206_v22  ;;  %v1129_v31 = vpack.c.bf16 %v1257_v29, %v1254_v23 }
 0x18a   : > { %1137 = vst [vmem:[%s1741_s17 + $0x38] sm:$0xff] %v1089_v30   ;;  %1145 = vst [vmem:[%s1741_s17 + $0x78] sm:$0xff] %v1129_v31  }
 0x18b   : > { %1472 = shalt.err (!%p1469_p7)
}
 0x18c   : > { %s1473_s24 = scalar_lea.hbm %s1762_s4, 2048  ;;  %s1477_s26 = scalar_lea.hbm %s1812_s2, 4096 }
 0x18d   : > { %p1474_p9 = scmp.ne.s32.totalorder %s1762_s4, %s1473_s24  ;;  %p1478_p5 = scmp.lt.u32.totalorder %s1762_s4, %s1812_s2 }
 0x18e   : > { %p1479_p11 = scmp.lt.u32.totalorder %s1477_s26, %s1473_s24  ;;  %p1481_p4 = scmp.lt.u32.totalorder %s1473_s24, %s1762_s4 }
 0x18f   : > { %p1475_p2 = pnand %p1474_p9, %p1646_p12 }
 0x190   : > { %p1480_p1 = por %p1479_p11, %p1478_p5 }
 0x191   : > { %p1476_p0 = pneg %p1475_p2 }
 0x192   : > { %p1482_p6 = por %p1481_p4, %p1480_p1 }
 0x194   : > { %p1483_p8 = pnand %p1482_p6, %p1476_p0 }
 0x196   : > { %1486 = shalt.err (!%p1483_p8)
}
 0x197   : > { %s1538_s3 = smov 64   ;;  %s1539_s15 = smov 4  }
 0x198   : > { %1280 = dma.vmem_to_hbm [thread:$0]  (%p1646_p12), %s1764_s22, 2048, %s1762_s4, %s823_s13, %s1538_s3, %s1538_s3, %s1539_s15  }
 0x199 PF: > { %s851_s17 = sand.u32 1, %s1517_s9   ;;  %p1827_p10 = scmp.ne.s32.totalorder %s1817_s16, 0 }
 0x19a   : > { %p1828_p13 = scmp.ge.s32.totalorder %s1529_s12, 2  ;;  %s852_s27 = scalar_lea.sflag [#allocation4], %s851_s17 }
 0x19c   : > { %p1291_p3 = pnand %p1828_p13, %p1827_p10 }
 0x19e   : > { %1512 = dma.done.wait (!%p1291_p3), %s852_s27, 2048  }
 0x19f   : > { %1514 = vsyncadd (!%p1291_p3), %s852_s27, 4294965248  ;;  %p16_p7 = scmp.ge.s32.totalorder %s1611_s21, 4   ;;  %s1829_s9 = smov %s1521_s10 }
 0x1a0   : > { %s1830_s10 = smov %s1525_s11  ;;  %s1831_s11 = smov %s1642_s8 }
 0x1a1   : > { %s1832_s12 = smov %s1611_s21  ;;  %18 = sbr.rel (!%p16_p7) target bundleno = 6 (0x6), region = 77 }
 0x1a8   :  { %857 = vsyncpa [#allocation3], 1 }
 0x1a9   :  { %859 = vsyncpa [#allocation3 + $0x1], 1 }
 0x1aa   :  { %860 = vsyncpa [#allocation6], 1 }
 0x1ab   :  { %861 = vsyncpa [#allocation4], 1 }
 0x1ac   :  { %863 = vsyncpa [#allocation4 + $0x1], 1 }

</bundles_post_ra>
